<compile_context>
chip_gen: v5e
topology: v5e:2x2
jax: 0.10.0
libtpu: 0.0.40
codegen_flags: <defaults>
</compile_context>

<pallas_src>
import functools

import jax
import jax.numpy as jnp
from jax.experimental import pallas as pl
from jax.experimental.pallas import tpu as pltpu

TILE = 128                    # node tile size (targets/rows and sources/cols)
NEG_SLOPE = 0.2               # GATv2 leaky_relu negative slope
LN_EPS = 1e-5                 # torch.nn.LayerNorm eps
MASK_BIAS = -1e30             # additive mask for non-edges
VMEM_LIMIT = 32 * 1024 * 1024


# ----------------------------- shared epilogue -----------------------------

def _layer_norm_act(h, gamma, beta, apply_relu):
    """torch.nn.LayerNorm over features (per node) + optional ReLU, in f32."""
    mean = jnp.mean(h, axis=1, keepdims=True)
    var = jnp.mean((h - mean) ** 2, axis=1, keepdims=True)
    y = (h - mean) * jax.lax.rsqrt(var + LN_EPS)
    y = y * gamma + beta
    if apply_relu:
        y = jnp.maximum(y, 0.0)
    return y


# ----------------------------- Pallas kernels -----------------------------

def _graph_prep_kernel(adj_ref, ahat_ref):
    """One-time graph prep: A_hat = D^-1/2 (A+I) D^-1/2, stored bf16."""
    adj = adj_ref[...]                                       # (Np, Np) f32, self loops in
    deg = jnp.sum(adj, axis=1, keepdims=True)                # in-degree (incl. self loop)
    dinv = jnp.where(deg > 0.0, jax.lax.rsqrt(deg), 0.0)     # D^-1/2 (0 for padded rows)
    ahat = adj * dinv * jnp.transpose(dinv)                  # dinv_i * A_ij * dinv_j
    ahat_ref[...] = ahat.astype(jnp.bfloat16)


def _gcn_kernel(ahat_ref, x_ref, w_ref, b_ref, g_ref, beta_ref, out_ref, acc_ref,
                *, agg_first, apply_relu):
    """Tiled GCN layer: accumulate over source tiles, LN(+ReLU) epilogue at last k.

    agg_first=True : acc += A_hat[i,k] @ X[k]      (carry F_in), then acc @ W at end
    agg_first=False: acc += A_hat[i,k] @ (X[k] @ W) (carry F_out)
    """
    k = pl.program_id(1)

    @pl.when(k == 0)
    def _init():
        acc_ref[...] = jnp.zeros(acc_ref.shape, acc_ref.dtype)

    x_bf16 = x_ref[...].astype(jnp.bfloat16)
    if agg_first:
        acc_ref[...] += jnp.dot(ahat_ref[...], x_bf16,
                                preferred_element_type=jnp.float32)
    else:
        xw = jnp.dot(x_bf16, w_ref[...], preferred_element_type=jnp.float32)
        acc_ref[...] += jnp.dot(ahat_ref[...], xw.astype(jnp.bfloat16),
                                preferred_element_type=jnp.float32)

    @pl.when(k == pl.num_programs(1) - 1)
    def _finalize():
        h = acc_ref[...]
        if agg_first:
            h = jnp.dot(h.astype(jnp.bfloat16), w_ref[...],
                        preferred_element_type=jnp.float32)
        h = h + b_ref[...]
        y = _layer_norm_act(h, g_ref[...], beta_ref[...], apply_relu)
        out_ref[...] = y.astype(out_ref.dtype)


def _gat_proj_kernel(x_ref, wlr_ref, blr_ref, xr_ref, xl_ref, xlt_ref):
    """GATv2 linear projections (lin_l | lin_r fused into one matmul).

    Outputs: xr = lin_r(x) (f32, target side), xl = lin_l(x) (bf16, aggregation
    operand), xlT = lin_l(x)^T (f32, lane-dense per-channel rows for the logits).
    The transpose is paid once per row tile here, outside the N^2 attention loop.
    """
    hc = xr_ref.shape[1]
    xlr = jnp.dot(x_ref[...].astype(jnp.bfloat16), wlr_ref[...],
                  preferred_element_type=jnp.float32) + blr_ref[...]   # (T, 2*HC)
    xl = xlr[:, :hc]
    xr_ref[...] = xlr[:, hc:]
    xl_ref[...] = xl.astype(xl_ref.dtype)
    xlt_ref[...] = xl.T


def _gat_attn_kernel(xr_ref, xl_ref, xlt_ref, ahat_ref, att_ref,
                     b_ref, g_ref, beta_ref, out_ref, m_ref, l_ref, acc_ref,
                     *, heads, head_dim, concat, apply_relu):
    """Flash-tiled GATv2 attention + conv bias + LayerNorm (+ReLU) epilogue.

    Grid: (target tiles, source tiles). Online softmax state (running max, sum,
    weighted accumulator) lives in VMEM scratch and is updated once per source
    tile with lane-dense stores.
    """
    ki = pl.program_id(1)
    hc = heads * head_dim
    tq = xr_ref.shape[0]

    @pl.when(ki == 0)
    def _init():
        m_ref[...] = jnp.full(m_ref.shape, -jnp.inf, m_ref.dtype)
        l_ref[...] = jnp.zeros(l_ref.shape, l_ref.dtype)
        acc_ref[...] = jnp.zeros(acc_ref.shape, acc_ref.dtype)

    # Additive edge mask derived from the A_hat tile already in VMEM (no
    # separate (N, N) f32 mask array). A_hat includes self loops.
    mask = jnp.where(ahat_ref[...] > 0, 0.0, MASK_BIAS).astype(jnp.float32)

    xr = xr_ref[...]        # (Tq, HC) f32   lin_r(x) for targets
    xlt = xlt_ref[...]      # (HC, Tk) f32   lin_l(x)^T for sources (lane-dense rows)
    xl = xl_ref[...]        # (Tk, HC) bf16  lin_l(x) for aggregation

    m_prev = m_ref[...]     # (Tq, H)
    l_prev = l_ref[...]     # (Tq, H)
    acc_prev = acc_ref[...]  # (Tq, HC)

    m_list, l_list, corr_list, o_list = [], [], [], []
    for h in range(heads):
        # Lane-dense logits: e_ij = sum_c a_c * leaky_relu(xr_ic + xl_jc) + mask_ij
        e = mask
        for c in range(head_dim):
            idx = h * head_dim + c
            s = xr[:, idx:idx + 1] + xlt[idx:idx + 1, :]          # (Tq, Tk)
            s = jnp.where(s > 0.0, s, NEG_SLOPE * s)              # leaky_relu(0.2)
            e = e + att_ref[0, idx] * s                           # scalar from SMEM

        m_h_prev = m_prev[:, h:h + 1]
        m_h = jnp.maximum(m_h_prev, jnp.max(e, axis=1, keepdims=True))
        p = jnp.exp(e - m_h)                                      # masked -> 0
        corr = jnp.exp(m_h_prev - m_h)
        l_h = corr * l_prev[:, h:h + 1] + jnp.sum(p, axis=1, keepdims=True)
        o_h = jnp.dot(p.astype(jnp.bfloat16),
                      xl[:, h * head_dim:(h + 1) * head_dim],
                      preferred_element_type=jnp.float32)         # (Tq, C)

        m_list.append(m_h)
        l_list.append(l_h)
        corr_list.append(jnp.broadcast_to(corr, (tq, head_dim)))
        o_list.append(o_h)

    # Single lane-dense update of the online-softmax state per source tile.
    m_ref[...] = jnp.concatenate(m_list, axis=1)
    l_ref[...] = jnp.concatenate(l_list, axis=1)
    corr_all = jnp.concatenate(corr_list, axis=1)                 # (Tq, HC)
    o_all = jnp.concatenate(o_list, axis=1)                       # (Tq, HC)
    acc_ref[...] = corr_all * acc_prev + o_all

    @pl.when(ki == pl.num_programs(1) - 1)
    def _finalize():
        inv_l = pl.reciprocal(l_ref[...], approx=True)            # (Tq, H)
        inv_full = jnp.concatenate(
            [jnp.broadcast_to(inv_l[:, h:h + 1], (tq, head_dim))
             for h in range(heads)], axis=1)                      # (Tq, HC)
        normalized = acc_ref[...] * inv_full
        if concat or heads == 1:
            h_all = normalized                                    # (Tq, HC) or (Tq, C)
        else:
            h_all = normalized[:, 0:head_dim]
            for h in range(1, heads):
                h_all = h_all + normalized[:, h * head_dim:(h + 1) * head_dim]
            h_all = h_all * (1.0 / heads)                         # mean over heads
        h_all = h_all + b_ref[...]                                # conv bias
        y = _layer_norm_act(h_all, g_ref[...], beta_ref[...], apply_relu)
        out_ref[...] = y.astype(out_ref.dtype)


# ----------------------------- kernel wrappers -----------------------------

def prepare_graph(adj_padded):
    """One pallas_call: symmetrically normalized adjacency in bf16."""
    n = adj_padded.shape[0]
    return pl.pallas_call(
        _graph_prep_kernel,
        out_shape=jax.ShapeDtypeStruct((n, n), jnp.bfloat16),
        compiler_params=pltpu.CompilerParams(vmem_limit_bytes=VMEM_LIMIT),
    )(adj_padded)


def gcn_layer(ahat, x, p, apply_relu, out_dtype):
    n_pad, f_in = x.shape
    f_out = p["w"].shape[1]
    agg_first = f_in <= f_out                     # carry the smaller feature dim
    acc_dim = f_in if agg_first else f_out
    ntiles = n_pad // TILE
    kern = functools.partial(_gcn_kernel, agg_first=agg_first, apply_relu=apply_relu)
    return pl.pallas_call(
        kern,
        out_shape=jax.ShapeDtypeStruct((n_pad, f_out), out_dtype),
        grid=(ntiles, ntiles),
        in_specs=[
            pl.BlockSpec((TILE, TILE), lambda i, k: (i, k)),     # A_hat tile
            pl.BlockSpec((TILE, f_in), lambda i, k: (k, 0)),     # X source tile
            pl.BlockSpec((f_in, f_out), lambda i, k: (0, 0)),    # W
            pl.BlockSpec((1, f_out), lambda i, k: (0, 0)),       # conv bias
            pl.BlockSpec((1, f_out), lambda i, k: (0, 0)),       # LN gamma
            pl.BlockSpec((1, f_out), lambda i, k: (0, 0)),       # LN beta
        ],
        out_specs=pl.BlockSpec((TILE, f_out), lambda i, k: (i, 0)),
        scratch_shapes=[pltpu.VMEM((TILE, acc_dim), jnp.float32)],
        compiler_params=pltpu.CompilerParams(
            dimension_semantics=("parallel", "arbitrary"),
            vmem_limit_bytes=VMEM_LIMIT),
    )(ahat, x, p["w"], p["bias"], p["gamma"], p["beta"])


def gat_layer(ahat, x, p, apply_relu, out_dtype):
    n_pad, f_in = x.shape
    heads, c, concat = p["heads"], p["head_dim"], p["concat"]
    hc = heads * c
    d_out = hc if concat else c
    ntiles = n_pad // TILE

    # 1) linear projections (row-tiled, "parallel"): xr, xl, xl^T
    xr, xl, xlt = pl.pallas_call(
        _gat_proj_kernel,
        out_shape=(jax.ShapeDtypeStruct((n_pad, hc), jnp.float32),
                   jax.ShapeDtypeStruct((n_pad, hc), jnp.bfloat16),
                   jax.ShapeDtypeStruct((hc, n_pad), jnp.float32)),
        grid=(ntiles,),
        in_specs=[
            pl.BlockSpec((TILE, f_in), lambda i: (i, 0)),
            pl.BlockSpec((f_in, 2 * hc), lambda i: (0, 0)),
            pl.BlockSpec((1, 2 * hc), lambda i: (0, 0)),
        ],
        out_specs=(pl.BlockSpec((TILE, hc), lambda i: (i, 0)),
                   pl.BlockSpec((TILE, hc), lambda i: (i, 0)),
                   pl.BlockSpec((hc, TILE), lambda i: (0, i))),
        compiler_params=pltpu.CompilerParams(
            dimension_semantics=("parallel",),
            vmem_limit_bytes=VMEM_LIMIT),
    )(x, p["wlr"], p["blr"])

    # 2) flash-tiled attention + epilogue
    kern = functools.partial(_gat_attn_kernel, heads=heads, head_dim=c,
                             concat=concat, apply_relu=apply_relu)
    return pl.pallas_call(
        kern,
        out_shape=jax.ShapeDtypeStruct((n_pad, d_out), out_dtype),
        grid=(ntiles, ntiles),
        in_specs=[
            pl.BlockSpec((TILE, hc), lambda i, k: (i, 0)),       # xr   (targets)
            pl.BlockSpec((TILE, hc), lambda i, k: (k, 0)),       # xl   (sources)
            pl.BlockSpec((hc, TILE), lambda i, k: (0, k)),       # xl^T (sources)
            pl.BlockSpec((TILE, TILE), lambda i, k: (i, k)),     # A_hat (mask source)
            pl.BlockSpec(memory_space=pltpu.MemorySpace.SMEM),   # att vector (scalars)
            pl.BlockSpec((1, d_out), lambda i, k: (0, 0)),       # conv bias
            pl.BlockSpec((1, d_out), lambda i, k: (0, 0)),       # LN gamma
            pl.BlockSpec((1, d_out), lambda i, k: (0, 0)),       # LN beta
        ],
        out_specs=pl.BlockSpec((TILE, d_out), lambda i, k: (i, 0)),
        scratch_shapes=[pltpu.VMEM((TILE, heads), jnp.float32),  # running max
                        pltpu.VMEM((TILE, heads), jnp.float32),  # running sum
                        pltpu.VMEM((TILE, hc), jnp.float32)],    # weighted acc
        compiler_params=pltpu.CompilerParams(
            dimension_semantics=("parallel", "arbitrary"),
            vmem_limit_bytes=VMEM_LIMIT),
    )(xr, xl, xlt, ahat, p["att"], p["bias"], p["gamma"], p["beta"])


# ----------------------------- layer / model glue -----------------------------

def hybrid_forward(x, adj, layers):
    n = x.shape[0]
    n_pad = ((n + TILE - 1) // TILE) * TILE
    adj_p = jnp.pad(adj, ((0, n_pad - n), (0, n_pad - n)))
    h = jnp.pad(x, ((0, n_pad - n), (0, 0)))

    ahat = prepare_graph(adj_p)                   # computed once, reused by all layers
    for i, layer in enumerate(layers):
        last = i == len(layers) - 1
        relu = not last                           # ReLU on all but the last layer
        out_dtype = jnp.float32 if last else jnp.bfloat16   # bf16 inter-layer traffic
        if layer["type"] == "gcn":
            h = gcn_layer(ahat, h, layer, relu, out_dtype)
        else:
            h = gat_layer(ahat, h, layer, relu, out_dtype)
    return h[:n]


def _glorot(key, shape):
    fan_in, fan_out = shape[0], shape[-1]
    limit = (6.0 / (fan_in + fan_out)) ** 0.5
    return jax.random.uniform(key, shape, jnp.float32, -limit, limit)


def build_model(key, in_channels, hidden_channels, num_layers, heads=8, out_channels=None):
    out_channels = out_channels or hidden_channels
    k_iter = iter(jax.random.split(key, 8 * num_layers))

    def row(v):
        return v.reshape(1, -1)

    def make_gcn(din, dout):
        return {
            "type": "gcn",
            "w": _glorot(next(k_iter), (din, dout)).astype(jnp.bfloat16),
            "bias": row(0.1 * jax.random.normal(next(k_iter), (dout,), jnp.float32)),
            "gamma": row(1.0 + 0.1 * jax.random.normal(next(k_iter), (dout,), jnp.float32)),
            "beta": row(0.1 * jax.random.normal(next(k_iter), (dout,), jnp.float32)),
        }

    def make_gat(din, c, h, concat):
        dout = h * c if concat else c
        wl = _glorot(next(k_iter), (din, h * c))
        bl = 0.1 * jax.random.normal(next(k_iter), (h * c,), jnp.float32)
        wr = _glorot(next(k_iter), (din, h * c))
        br = 0.1 * jax.random.normal(next(k_iter), (h * c,), jnp.float32)
        return {
            "type": "gat", "heads": h, "head_dim": c, "concat": concat,
            # lin_l / lin_r fused into one matmul operand (bf16 for the MXU)
            "wlr": jnp.concatenate([wl, wr], axis=1).astype(jnp.bfloat16),
            "blr": row(jnp.concatenate([bl, br])),
            "att": row(_glorot(next(k_iter), (h, c))),    # (1, h*c) f32 -> SMEM
            "bias": row(0.1 * jax.random.normal(next(k_iter), (dout,), jnp.float32)),
            "gamma": row(1.0 + 0.1 * jax.random.normal(next(k_iter), (dout,), jnp.float32)),
            "beta": row(0.1 * jax.random.normal(next(k_iter), (dout,), jnp.float32)),
        }

    layers = [make_gcn(in_channels, hidden_channels)]
    hidden_dim = hidden_channels
    for i in range(1, num_layers - 1):
        if i % 2 == 0:
            layers.append(make_gcn(hidden_dim, hidden_channels))
            hidden_dim = hidden_channels
        else:
            gat_hidden = hidden_channels // heads
            layers.append(make_gat(hidden_dim, gat_hidden, heads, True))
            hidden_dim = gat_hidden * heads
    # last layer: GATv2Conv(hidden_channels, out_channels, heads=1, concat=False)
    layers.append(make_gat(hidden_channels, out_channels, 1, False))
    return layers


def edge_index_to_adj(edge_index, num_nodes):
    src, dst = edge_index[0], edge_index[1]
    adj = jnp.zeros((num_nodes, num_nodes), jnp.float32)
    adj = adj.at[dst, src].set(1.0)                 # adj[target, source] = 1
    eye = jnp.eye(num_nodes, dtype=bool)
    return jnp.where(eye, 1.0, adj)                 # add (remaining) self loops


# ----------------------------- demo -----------------------------

if __name__ == "__main__":
    # 200 real nodes padded to 256 -> 2x2 tile grid exercises the flash loop and
    # the padding/mask path while staying small.
    N, IN, HID, NUM_LAYERS, HEADS = 200, 8, 32, 4, 8

    key = jax.random.PRNGKey(0)
    k_x, k_p = jax.random.split(key)
    x = jax.random.normal(k_x, (N, IN), jnp.float32)

    # deterministic bidirectional ring graph: edge_index shape (2, 2N)
    idx = jnp.arange(N)
    src = jnp.concatenate([idx, (idx + 1) % N])
    dst = jnp.concatenate([(idx + 1) % N, idx])
    edge_index = jnp.stack([src, dst]).astype(jnp.int32)

    adj = edge_index_to_adj(edge_index, N)
    layers = build_model(k_p, IN, HID, NUM_LAYERS, heads=HEADS)

    out = hybrid_forward(x, adj, layers)
    out = jax.block_until_ready(out)
    assert out.shape == (N, HID) and out.dtype == jnp.float32
    assert bool(jnp.all(jnp.isfinite(out)))
    print("KERNEL_OK")
</pallas_src>

<mosaic_0001>
module attributes {stable_mosaic.version = 11 : i64} {
  func.func @_graph_prep_kernel(%arg0: memref<256x256xf32, #tpu.memory_space<vmem>>, %arg1: memref<256x256xbf16, #tpu.memory_space<vmem>>) attributes {dimension_semantics = [], scalar_prefetch = 0 : i64, scratch_operands = 0 : i64, tpu.core_type = #tpu.core_type<tc>} {
    %c0 = arith.constant 0 : index
    %c0_0 = arith.constant 0 : index
    %0 = vector.load %arg0[%c0, %c0_0] : memref<256x256xf32, #tpu.memory_space<vmem>>, vector<256x256xf32>
    %cst = arith.constant dense<0.000000e+00> : vector<256xf32>
    %1 = vector.multi_reduction <add>, %0, %cst [1] : vector<256x256xf32> to vector<256xf32>
    %2 = vector.shape_cast %1 : vector<256xf32> to vector<256x1xf32>
    %cst_1 = arith.constant 0.000000e+00 : f32
    %3 = vector.broadcast %cst_1 : f32 to vector<256x1xf32>
    %4 = arith.cmpf ogt, %2, %3 : vector<256x1xf32>
    %5 = math.rsqrt %2 : vector<256x1xf32>
    %cst_2 = arith.constant 0.000000e+00 : f32
    %6 = vector.broadcast %cst_2 : f32 to vector<256x1xf32>
    %7 = arith.select %4, %5, %6 : vector<256x1xi1>, vector<256x1xf32>
    %8 = vector.broadcast %7 : vector<256x1xf32> to vector<256x256xf32>
    %9 = arith.mulf %0, %8 : vector<256x256xf32>
    %10 = tpu.transpose %7, [1, 0] : vector<256x1xf32> -> vector<1x256xf32>
    %11 = vector.broadcast %10 : vector<1x256xf32> to vector<256x256xf32>
    %12 = arith.mulf %9, %11 : vector<256x256xf32>
    %13 = arith.truncf %12 : vector<256x256xf32> to vector<256x256xbf16>
    %c0_3 = arith.constant 0 : index
    %c0_4 = arith.constant 0 : index
    %14 = vector.load %arg1[%c0_3, %c0_4] : memref<256x256xbf16, #tpu.memory_space<vmem>>, vector<256x256xbf16>
    tpu.vector_store %arg1[%c0_3, %c0_4], %13 {strides = array<i32>} : memref<256x256xbf16, #tpu.memory_space<vmem>>, vector<256x256xbf16>,
    return
  }
}

</mosaic_0001>

<bundles_post_ra>
// kernel: tpu_custom_call.1
= control target key start
LH: loop header
LB: loop body
LE: loop exit
PB: predicated region body
PF: predicated region fallthrough
CT: control target
= control target key end

     0   :  { %6 = vsyncpa [#allocation3], 0  ;;  %s1800_s0 = inlined_call_operand.hbm [shape: f32[256,256], index: 0, kind: input, shape index: {}]   ;;  %s1801_s1 = inlined_call_operand.hbm [shape: bf16[256,256], index: 1, kind: output, shape index: {}]  }
   0x1   :  { %7 = vsyncpa [#allocation4], 0  ;;  %s12_s8 = sshll.u32 %s1800_s0, 4  ;;  %s1032_s9 = smov [#allocation2]   ;;  %s13_s8 = int_to_ptr.hbm [resolvable:$true] %s12_s8 }
   0x2   :  { %s14_s10 = sshll.u32 %s1032_s9, 4  ;;  %s1033_s11 = smov 256   ;;  %s15_s10 = int_to_ptr.vmem [resolvable:$true] %s14_s10 }
   0x3   :  { %s1034_s12 = smov 16  }
   0x4   :  { %20 = dma.hbm_to_vmem [thread:$0]  %s13_s8, 8192, %s15_s10, [#allocation3], %s1033_s11, %s1033_s11, %s1034_s12  }
   0x5   :  { %1028 = dma.done.wait [#allocation3], 8192  }
   0x6   :  { %1029 = vsyncadd [#allocation3], 4294959104  ;;  %v33_v0 = vld [vmem:[#allocation2 + $0x40] sm:$0xff]  ;;  %v34_v1 = vld [vmem:[#allocation2 + $0x48] sm:$0xff]  ;;  %s1035_s0 = smov [#allocation5]   ;;  %s833_s16 = sshll.u32 %s1801_s1, 4  ;;  %s834_s16 = int_to_ptr.hbm [resolvable:$true] %s833_s16 }
   0x7   :  { %v29_v2 = vld [vmem:[#allocation2 + $0x20] sm:$0xff]  ;;  %v101_v3 = vadd.f32 %v34_v1, %v33_v0  ;;  %v30_v4 = vld [vmem:[#allocation2 + $0x28] sm:$0xff]  ;;  %v35_v9 = vld [vmem:[#allocation2 + $0x50] sm:$0xff]  ;;  %s831_s13 = sshll.u32 %s1035_s0, 4  ;;  %s1036_s17 = smov 128   ;;  %s832_s13 = int_to_ptr.vmem [resolvable:$true] %s831_s13 }
   0x8   :  { %v25_v5 = vld [vmem:[#allocation2] sm:$0xff]  ;;  %v26_v6 = vld [vmem:[#allocation2 + $0x8] sm:$0xff]  ;;  %v95_v7 = vadd.f32 %v30_v4, %v29_v2  ;;  %v36_v10 = vld [vmem:[#allocation2 + $0x58] sm:$0xff]  ;;  %s1037_s18 = smov 8  }
   0x9   :  { %v89_v8 = vadd.f32 %v26_v6, %v25_v5  ;;  %102 = vadd.xlane.f32.xlu2 %v101_v3  ;;  %v31_v11 = vld [vmem:[#allocation2 + $0x30] sm:$0xff]  ;;  %v32_v12 = vld [vmem:[#allocation2 + $0x38] sm:$0xff]  ;;  %v104_v15 = vadd.f32 %v36_v10, %v35_v9  ;;  %v41_v18 = vld [vmem:[#allocation2 + $0x80] sm:$0xff] }
   0xa   :  { %96 = vadd.xlane.f32.xlu1 %v95_v7  ;;  %v27_v13 = vld [vmem:[#allocation2 + $0x10] sm:$0xff]  ;;  %v28_v14 = vld [vmem:[#allocation2 + $0x18] sm:$0xff]  ;;  %v98_v16 = vadd.f32 %v32_v12, %v31_v11  ;;  %v42_v19 = vld [vmem:[#allocation2 + $0x88] sm:$0xff] }
   0xb   :  { %90 = vadd.xlane.f32.xlu0 %v89_v8  ;;  %v92_v17 = vadd.f32 %v28_v14, %v27_v13  ;;  %v39_v20 = vld [vmem:[#allocation2 + $0x70] sm:$0xff]  ;;  %v40_v21 = vld [vmem:[#allocation2 + $0x78] sm:$0xff]  ;;  %v37_v22 = vld [vmem:[#allocation2 + $0x60] sm:$0xff]  ;;  %v113_v24 = vadd.f32 %v42_v19, %v41_v18 }
   0xc   :  { %v38_v23 = vld [vmem:[#allocation2 + $0x68] sm:$0xff]  ;;  %v110_v25 = vadd.f32 %v40_v21, %v39_v20  ;;  %v47_v27 = vld [vmem:[#allocation2 + $0xb0] sm:$0xff]  ;;  %v48_v28 = vld [vmem:[#allocation2 + $0xb8] sm:$0xff] }
   0xd   :  { %v107_v26 = vadd.f32 %v38_v23, %v37_v22  ;;  %v45_v29 = vld [vmem:[#allocation2 + $0xa0] sm:$0xff]  ;;  %v46_v30 = vld [vmem:[#allocation2 + $0xa8] sm:$0xff]  ;;  %v43_v31 = vld [vmem:[#allocation2 + $0x90] sm:$0xff]  ;;  %v122_v33 = vadd.f32 %v48_v28, %v47_v27 }
   0xe   :  { %v44_v32 = vld [vmem:[#allocation2 + $0x98] sm:$0xff]  ;;  %v119_v34 = vadd.f32 %v46_v30, %v45_v29  ;;  %v53_v36 = vld [vmem:[#allocation2 + $0xe0] sm:$0xff]  ;;  %v54_v37 = vld [vmem:[#allocation2 + $0xe8] sm:$0xff] }
   0xf   :  { %v116_v35 = vadd.f32 %v44_v32, %v43_v31  ;;  %v51_v38 = vld [vmem:[#allocation2 + $0xd0] sm:$0xff]  ;;  %v52_v39 = vld [vmem:[#allocation2 + $0xd8] sm:$0xff]  ;;  %v49_v40 = vld [vmem:[#allocation2 + $0xc0] sm:$0xff]  ;;  %v131_v42 = vadd.f32 %v54_v37, %v53_v36 }
  0x10   :  { %v50_v41 = vld [vmem:[#allocation2 + $0xc8] sm:$0xff]  ;;  %v128_v43 = vadd.f32 %v52_v39, %v51_v38  ;;  %v59_v45 = vld [vmem:[#allocation2 + $0x110] sm:$0xff]  ;;  %v60_v46 = vld [vmem:[#allocation2 + $0x118] sm:$0xff] }
  0x11   :  { %105 = vadd.xlane.f32.xlu2 %v104_v15  ;;  %v125_v44 = vadd.f32 %v50_v41, %v49_v40  ;;  %v57_v47 = vld [vmem:[#allocation2 + $0x100] sm:$0xff]  ;;  %v58_v48 = vld [vmem:[#allocation2 + $0x108] sm:$0xff]  ;;  %v55_v49 = vld [vmem:[#allocation2 + $0xf0] sm:$0xff]  ;;  %v140_v51 = vadd.f32 %v60_v46, %v59_v45 }
  0x12   :  { %99 = vadd.xlane.f32.xlu1 %v98_v16  ;;  %v56_v50 = vld [vmem:[#allocation2 + $0xf8] sm:$0xff]  ;;  %v137_v52 = vadd.f32 %v58_v48, %v57_v47  ;;  %v63_v54 = vld [vmem:[#allocation2 + $0x130] sm:$0xff]  ;;  %v65_v55 = vld [vmem:[#allocation2 + $0x140] sm:$0xff] }
  0x13   :  { %93 = vadd.xlane.f32.xlu0 %v92_v17  ;;  %v134_v53 = vadd.f32 %v56_v50, %v55_v49  ;;  %v66_v56 = vld [vmem:[#allocation2 + $0x148] sm:$0xff]  ;;  %v64_v57 = vld [vmem:[#allocation2 + $0x138] sm:$0xff]  ;;  %v61_v58 = vld [vmem:[#allocation2 + $0x120] sm:$0xff] }
  0x14   :  { %v62_v59 = vld [vmem:[#allocation2 + $0x128] sm:$0xff]  ;;  %v149_v60 = vadd.f32 %v66_v56, %v65_v55  ;;  %v146_v61 = vadd.f32 %v64_v57, %v63_v54  ;;  %v67_v63 = vld [vmem:[#allocation2 + $0x150] sm:$0xff]  ;;  %v72_v1 = vld [vmem:[#allocation2 + $0x178] sm:$0xff] }
  0x15   :  { %v143_v62 = vadd.f32 %v62_v59, %v61_v58  ;;  %v71_v0 = vld [vmem:[#allocation2 + $0x170] sm:$0xff]  ;;  %v68_v2 = vld [vmem:[#allocation2 + $0x158] sm:$0xff]  ;;  %v69_v3 = vld [vmem:[#allocation2 + $0x160] sm:$0xff] }
  0x16   :  { %v70_v4 = vld [vmem:[#allocation2 + $0x168] sm:$0xff]  ;;  %v158_v5 = vadd.f32 %v72_v1, %v71_v0  ;;  %v152_v6 = vadd.f32 %v68_v2, %v67_v63  ;;  %v77_v8 = vld [vmem:[#allocation2 + $0x1a0] sm:$0xff]  ;;  %v75_v12 = vld [vmem:[#allocation2 + $0x190] sm:$0xff] }
  0x17   :  { %v155_v7 = vadd.f32 %v70_v4, %v69_v3  ;;  %v78_v9 = vld [vmem:[#allocation2 + $0x1a8] sm:$0xff]  ;;  %v73_v10 = vld [vmem:[#allocation2 + $0x180] sm:$0xff]  ;;  %v76_v13 = vld [vmem:[#allocation2 + $0x198] sm:$0xff] }
  0x18   :  { %v74_v11 = vld [vmem:[#allocation2 + $0x188] sm:$0xff]  ;;  %v167_v14 = vadd.f32 %v78_v9, %v77_v8  ;;  %v164_v16 = vadd.f32 %v76_v13, %v75_v12  ;;  %v83_v17 = vld [vmem:[#allocation2 + $0x1d0] sm:$0xff]  ;;  %v84_v18 = vld [vmem:[#allocation2 + $0x1d8] sm:$0xff] }
  0x19   :  { %114 = vadd.xlane.f32.xlu2 %v113_v24  ;;  %v161_v15 = vadd.f32 %v74_v11, %v73_v10  ;;  %v79_v19 = vld [vmem:[#allocation2 + $0x1b0] sm:$0xff]  ;;  %v80_v20 = vld [vmem:[#allocation2 + $0x1b8] sm:$0xff]  ;;  %v176_v21 = vadd.f32 %v84_v18, %v83_v17  ;;  %v85_v23 = vld [vmem:[#allocation2 + $0x1e0] sm:$0xff] }
  0x1a   :  { %111 = vadd.xlane.f32.xlu1 %v110_v25  ;;  %v170_v22 = vadd.f32 %v80_v20, %v79_v19  ;;  %v86_v24 = vld [vmem:[#allocation2 + $0x1e8] sm:$0xff]  ;;  %v87_v29 = vld [vmem:[#allocation2 + $0x1f0] sm:$0xff]  ;;  %v88_v30 = vld [vmem:[#allocation2 + $0x1f8] sm:$0xff] }
  0x1b   :  { %108 = vadd.xlane.f32.xlu0 %v107_v26  ;;  %v179_v25 = vadd.f32 %v86_v24, %v85_v23  ;;  %v81_v26 = vld [vmem:[#allocation2 + $0x1c0] sm:$0xff]  ;;  %v82_v27 = vld [vmem:[#allocation2 + $0x1c8] sm:$0xff]  ;;  %v182_v31 = vadd.f32 %v88_v30, %v87_v29 }
  0x1c   :  { %v173_v28 = vadd.f32 %v82_v27, %v81_v26 }
  0x21   :  { %123 = vadd.xlane.f32.xlu2 %v122_v33 }
  0x22   :  { %120 = vadd.xlane.f32.xlu1 %v119_v34 }
  0x23   :  { %117 = vadd.xlane.f32.xlu0 %v116_v35 }
  0x29   :  { %132 = vadd.xlane.f32.xlu2 %v131_v42 }
  0x2a   :  { %129 = vadd.xlane.f32.xlu1 %v128_v43 }
  0x2b   :  { %126 = vadd.xlane.f32.xlu0 %v125_v44 }
  0x31   :  { %141 = vadd.xlane.f32.xlu2 %v140_v51 }
  0x32   :  { %138 = vadd.xlane.f32.xlu1 %v137_v52 }
  0x33   :  { %135 = vadd.xlane.f32.xlu0 %v134_v53 }
  0x39   :  { %150 = vadd.xlane.f32.xlu2 %v149_v60 }
  0x3a   :  { %147 = vadd.xlane.f32.xlu1 %v146_v61 }
  0x3b   :  { %144 = vadd.xlane.f32.xlu0 %v143_v62 }
  0x41   :  { %159 = vadd.xlane.f32.xlu2 %v158_v5 }
  0x42   :  { %156 = vadd.xlane.f32.xlu1 %v155_v7 }
  0x43   :  { %153 = vadd.xlane.f32.xlu0 %v152_v6 }
  0x49   :  { %168 = vadd.xlane.f32.xlu2 %v167_v14 }
  0x4a   :  { %165 = vadd.xlane.f32.xlu1 %v164_v16 }
  0x4b   :  { %162 = vadd.xlane.f32.xlu0 %v161_v15 }
  0x51   :  { %177 = vadd.xlane.f32.xlu2 %v176_v21 }
  0x52   :  { %174 = vadd.xlane.f32.xlu1 %v173_v28 }
  0x53   :  { %171 = vadd.xlane.f32.xlu0 %v170_v22 }
  0x5a   :  { %183 = vadd.xlane.f32.xlu1 %v182_v31 }
  0x5b   :  { %180 = vadd.xlane.f32.xlu0 %v179_v25 }
  0x7c   :  { %v1051_v32 = vpop.xlane.xlu2 %102 }
  0x7d   :  { %v1053_v33 = vpop.xlane.xlu1 %96 }
  0x7e   :  { %v91_v34 = vpop.xlane.xlu0 %90  ;;  %vm243_vm9 = vweird.f32 %v1053_v33  ;;  %vm187_vm11 = vcmp.gt.f32.partialorder %v1053_v33, 0.0 }
  0x7f   :  { %852 = vrsqrt.f32 %v91_v34  ;;  %vm223_vm0 = vweird.f32 %v91_v34  ;;  %vm185_vm3 = vcmp.gt.f32.partialorder %v91_v34, 0.0 }
  0x80   :  { %854 = vrsqrt.f32 %v1053_v33 }
  0x84   :  { %v1056_v35 = vpop.xlane.xlu2 %105 }
  0x85   :  { %v853_v36 = vpop.eup %852  ;;  %v1058_v37 = vpop.xlane.xlu1 %99 }
  0x86   :  { %v94_v38 = vpop.xlane.xlu0 %93  ;;  %v218_v39 = vmul.f32 %v853_v36, %v91_v34  ;;  %v855_v40 = vpop.eup %854  ;;  %vm224_vm1 = vweird.f32 %v853_v36  ;;  %vm253_vm13 = vweird.f32 %v1058_v37  ;;  %vm188_vm15 = vcmp.gt.f32.partialorder %v1058_v37, 0.0 }
  0x87   :  { %856 = vrsqrt.f32 %v94_v38  ;;  %v238_v43 = vmul.f32 %v855_v40, %v1053_v33  ;;  %vm225_vm2 = vmor %vm223_vm0, %vm224_vm1  ;;  %vm233_vm4 = vweird.f32 %v94_v38  ;;  %vm186_vm7 = vcmp.gt.f32.partialorder %v94_v38, 0.0 }
  0x88   :  { %v219_v41 = vmul.f32 %v853_v36, %v218_v39  ;;  %858 = vrsqrt.f32 %v1058_v37  ;;  %vm244_vm8 = vweird.f32 %v855_v40  ;;  %vm263_vm0 = vweird.f32 %v1051_v32 }
  0x89   :  { %v239_v50 = vmul.f32 %v855_v40, %v238_v43  ;;  %860 = vrsqrt.f32 %v1051_v32  ;;  %vm245_vm10 = vmor %vm243_vm9, %vm244_vm8 }
  0x8a   :  { %v220_v42 = vmul.f32 0.5, %v219_v41  ;;  %862 = vrsqrt.f32 %v1056_v35 }
  0x8b   :  { %v240_v57 = vmul.f32 0.5, %v239_v50 }
  0x8c   :  { %v221_v44 = vsub.f32 1.5, %v220_v42  ;;  %v1062_v45 = vpop.xlane.xlu2 %114 }
  0x8d   :  { %v857_v46 = vpop.eup %856  ;;  %v1064_v47 = vpop.xlane.xlu1 %111  ;;  %v241_v63 = vsub.f32 1.5, %v240_v57 }
  0x8e   :  { %v1066_v48 = vpop.xlane.xlu0 %108  ;;  %v228_v49 = vmul.f32 %v857_v46, %v94_v38  ;;  %v222_v51 = vmul.f32 %v853_v36, %v221_v44  ;;  %v1068_v52 = vpop.eup %858  ;;  %vm234_vm5 = vweird.f32 %v857_v46 }
  0x8f   :  { %v248_v58 = vmul.f32 %v1068_v52, %v1058_v37  ;;  %v1083_v2 = vpop.eup %860  ;;  %vm235_vm6 = vmor %vm233_vm4, %vm234_vm5  ;;  %v242_v7 = vmul.f32 %v855_v40, %v241_v63  ;;  %864 = vrsqrt.f32 %v1066_v48  ;;  %vm254_vm12 = vweird.f32 %v1068_v52 }
  0x90   :  { %v229_v53 = vmul.f32 %v857_v46, %v228_v49  ;;  %v226_v54 = vsel %vm225_vm2, %v853_v36, %v222_v51  ;;  %v258_v5 = vmul.f32 %v1083_v2, %v1051_v32  ;;  %v1098_v11 = vpop.eup %862  ;;  %vm255_vm14 = vmor %vm253_vm13, %vm254_vm12  ;;  %vm264_vm1 = vweird.f32 %v1083_v2 }
  0x91   :  { %v1071_v56 = vsel %vm185_vm3, %v226_v54, 0.0  ;;  %v249_v0 = vmul.f32 %v1068_v52, %v248_v58  ;;  %v246_v14 = vsel %vm245_vm10, %v855_v40, %v242_v7  ;;  %v268_v15 = vmul.f32 %v1098_v11, %v1056_v35  ;;  %vm265_vm2 = vmor %vm263_vm0, %vm264_vm1 }
  0x92   :  { %v230_v55 = vmul.f32 0.5, %v229_v53  ;;  %633 = vxpose.xlu2.b32.start [1/16] (narrow) %v1071_v56, 8  ;;  %v259_v12 = vmul.f32 %v1083_v2, %v258_v5  ;;  %v1105_v16 = vsel %vm187_vm11, %v246_v14, 0.0  ;;  %vm189_vm3 = vcmp.gt.f32.partialorder %v1051_v32, 0.0 }
  0x93   :  { %v250_v6 = vmul.f32 0.5, %v249_v0  ;;  %v269_v22 = vmul.f32 %v1098_v11, %v268_v15  ;;  %vm273_vm4 = vweird.f32 %v1056_v35  ;;  %vm274_vm5 = vweird.f32 %v1098_v11 }
  0x94   :  { %v231_v59 = vsub.f32 1.5, %v230_v55  ;;  %v1076_v60 = vpop.xlane.xlu2 %123  ;;  %v260_v17 = vmul.f32 0.5, %v259_v12  ;;  %vm1164_vm8 = vmor %vm273_vm4, %vm274_vm5  ;;  %vm190_vm11 = vcmp.gt.f32.partialorder %v1056_v35, 0.0  ;;  %vm191_vm4 = vcmp.gt.f32.partialorder %v1066_v48, 0.0 }
  0x95   :  { %v1078_v61 = vpop.xlane.xlu1 %120  ;;  %v251_v13 = vsub.f32 1.5, %v250_v6  ;;  %v1121_v25 = vpop.eup %864  ;;  %v270_v26 = vmul.f32 0.5, %v269_v22 }
  0x96   :  { %v1080_v62 = vpop.xlane.xlu0 %117  ;;  %v232_v1 = vmul.f32 %v857_v46, %v231_v59  ;;  %v261_v23 = vsub.f32 1.5, %v260_v17  ;;  %v278_v29 = vmul.f32 %v1121_v25, %v1066_v48 }
  0x97   :  { %v252_v18 = vmul.f32 %v1068_v52, %v251_v13  ;;  %v271_v38 = vsub.f32 1.5, %v270_v26 }
  0x98   :  { %v236_v3 = vsel %vm235_vm6, %v857_v46, %v232_v1  ;;  %v262_v30 = vmul.f32 %v1083_v2, %v261_v23  ;;  %v279_v41 = vmul.f32 %v1121_v25, %v278_v29 }
  0x99   :  { %v1086_v4 = vsel %vm186_vm7, %v236_v3, 0.0  ;;  %v256_v24 = vsel %vm255_vm14, %v1068_v52, %v252_v18  ;;  %v272_v53 = vmul.f32 %v1098_v11, %v271_v38  ;;  %vm283_vm14 = vweird.f32 %v1066_v48 }
  0x9a   :  { %634 = vxpose.xlu2.b32.cont [2/16] (narrow) %v1086_v4, 8  ;;  %v1125_v27 = vsel %vm188_vm15, %v256_v24, 0.0  ;;  %v266_v43 = vsel %vm265_vm2, %v1083_v2, %v262_v30  ;;  %v280_v51 = vmul.f32 0.5, %v279_v41  ;;  %vm284_vm15 = vweird.f32 %v1121_v25 }
  0x9b   :  { %v1154_v50 = vsel %vm189_vm3, %v266_v43, 0.0  ;;  %v276_v5 = vsel %vm1164_vm8, %v1098_v11, %v272_v53  ;;  %vm1208_vm1 = vmor %vm283_vm14, %vm284_vm15  ;;  %vm293_vm8 = vweird.f32 %v1064_v47  ;;  %vm303_vm15 = vweird.f32 %v1062_v45 }
  0x9c   :  { %v1091_v8 = vpop.xlane.xlu2 %132  ;;  %v281_v2 = vsub.f32 1.5, %v280_v51  ;;  %v1193_v15 = vsel %vm190_vm11, %v276_v5, 0.0 }
  0x9d   :  { %v1094_v9 = vpop.xlane.xlu1 %129 }
  0x9e   :  { %v1096_v10 = vpop.xlane.xlu0 %126  ;;  %v282_v35 = vmul.f32 %v1121_v25, %v281_v2 }
  0xa2   :  { %635 = vxpose.xlu2.b32.cont [3/16] (narrow) %v1105_v16, 8 }
  0xa4   :  { %v1110_v19 = vpop.xlane.xlu2 %141 }
  0xa5   :  { %866 = vrsqrt.f32 %v1110_v19  ;;  %v1114_v20 = vpop.xlane.xlu1 %138  ;;  %vm393_vm12 = vweird.f32 %v1110_v19  ;;  %vm202_vm2 = vcmp.gt.f32.partialorder %v1110_v19, 0.0 }
  0xa6   :  { %v1116_v21 = vpop.xlane.xlu0 %135  ;;  %868 = vrsqrt.f32 %v1114_v20  ;;  %vm383_vm7 = vweird.f32 %v1114_v20  ;;  %vm201_vm10 = vcmp.gt.f32.partialorder %v1114_v20, 0.0 }
  0xa7   :  { %870 = vrsqrt.f32 %v1064_v47 }
  0xaa   :  { %636 = vxpose.xlu2.b32.cont [4/16] (narrow) %v1125_v27, 8 }
  0xab   :  { %v1127_v28 = vpop.eup %866 }
  0xac   :  { %v869_v31 = vpop.eup %868  ;;  %v388_v33 = vmul.f32 %v1127_v28, %v1110_v19  ;;  %v1162_v32 = vpop.xlane.xlu2 %150  ;;  %vm394_vm13 = vweird.f32 %v1127_v28 }
  0xad   :  { %v378_v34 = vmul.f32 %v869_v31, %v1114_v20  ;;  %v1138_v36 = vpop.xlane.xlu1 %147  ;;  %v1143_v40 = vpop.eup %870  ;;  %vm384_vm6 = vweird.f32 %v869_v31  ;;  %vm395_vm0 = vmor %vm393_vm12, %vm394_vm13  ;;  %vm192_vm13 = vcmp.gt.f32.partialorder %v1064_v47, 0.0 }
  0xae   :  { %v1140_v37 = vpop.xlane.xlu0 %144  ;;  %v389_v39 = vmul.f32 %v1127_v28, %v388_v33  ;;  %v288_v49 = vmul.f32 %v1143_v40, %v1064_v47  ;;  %vm385_vm9 = vmor %vm383_vm7, %vm384_vm6  ;;  %v286_v33 = vsel %vm1208_vm1, %v1121_v25, %v282_v35  ;;  %vm294_vm6 = vweird.f32 %v1143_v40 }
  0xaf   :  { %v379_v42 = vmul.f32 %v869_v31, %v378_v34  ;;  %872 = vrsqrt.f32 %v1140_v37  ;;  %vm403_vm3 = vweird.f32 %v1140_v37  ;;  %v1229_v41 = vsel %vm191_vm4, %v286_v33, 0.0 }
  0xb0   :  { %874 = vrsqrt.f32 %v1138_v36  ;;  %v390_v44 = vmul.f32 0.5, %v389_v39  ;;  %v289_v63 = vmul.f32 %v1143_v40, %v288_v49  ;;  %vm203_vm11 = vcmp.gt.f32.partialorder %v1140_v37, 0.0 }
  0xb1   :  { %876 = vrsqrt.f32 %v1062_v45  ;;  %v380_v46 = vmul.f32 0.5, %v379_v42  ;;  %vm204_vm1 = vcmp.gt.f32.partialorder %v1138_v36, 0.0 }
  0xb2   :  { %637 = vxpose.xlu2.b32.cont [5/16] (narrow) %v1154_v50, 8  ;;  %v391_v55 = vsub.f32 1.5, %v390_v44  ;;  %878 = vrsqrt.f32 %v1080_v62  ;;  %v290_v17 = vmul.f32 0.5, %v289_v63 }
  0xb3   :  { %v381_v52 = vsub.f32 1.5, %v380_v46  ;;  %880 = vrsqrt.f32 %v1162_v32 }
  0xb4   :  { %v392_v13 = vmul.f32 %v1127_v28, %v391_v55  ;;  %882 = vrsqrt.f32 %v1078_v61 }
  0xb5   :  { %v1159_v54 = vpop.eup %872  ;;  %v382_v57 = vmul.f32 %v869_v31, %v381_v52  ;;  %v1244_v49 = vpop.xlane.xlu1 %156 }
  0xb6   :  { %v1168_v59 = vpop.eup %874  ;;  %v398_v0 = vmul.f32 %v1159_v54, %v1140_v37  ;;  %v1202_v23 = vpop.xlane.xlu0 %153  ;;  %v396_v24 = vsel %vm395_vm0, %v1127_v28, %v392_v13  ;;  %vm404_vm5 = vweird.f32 %v1159_v54 }
  0xb7   :  { %v1174_v1 = vpop.eup %876  ;;  %v386_v3 = vsel %vm385_vm9, %v869_v31, %v382_v57  ;;  %v408_v12 = vmul.f32 %v1168_v59, %v1138_v36  ;;  %v291_v31 = vsub.f32 1.5, %v290_v17  ;;  %884 = vrsqrt.f32 %v1202_v23  ;;  %vm1236_vm7 = vmor %vm403_vm3, %vm404_vm5  ;;  %v1280_v13 = vpop.xlane.xlu2 %159 }
  0xb8   :  { %v399_v6 = vmul.f32 %v1159_v54, %v398_v0  ;;  %v1182_v7 = vsel %vm201_vm10, %v386_v3, 0.0  ;;  %v298_v11 = vmul.f32 %v1174_v1, %v1062_v45  ;;  %v1199_v18 = vpop.eup %878  ;;  %v1219_v28 = vsel %vm202_vm2, %v396_v24, 0.0  ;;  %vm295_vm9 = vmor %vm293_vm8, %vm294_vm6 }
  0xb9   :  { %665 = vxpose.xlu0.b32.start [1/16] (narrow) %v1182_v7, 8  ;;  %v409_v20 = vmul.f32 %v1168_v59, %v408_v12  ;;  %v1205_v26 = vpop.eup %880  ;;  %v308_v25 = vmul.f32 %v1199_v18, %v1080_v62  ;;  %v292_v48 = vmul.f32 %v1143_v40, %v291_v31  ;;  %886 = vrsqrt.f32 %v1076_v60 }
  0xba   :  { %v400_v14 = vmul.f32 0.5, %v399_v6  ;;  %638 = vxpose.xlu2.b32.cont [6/16] (narrow) %v1193_v15, 8  ;;  %v299_v29 = vmul.f32 %v1174_v1, %v298_v11  ;;  %v418_v38 = vmul.f32 %v1205_v26, %v1162_v32  ;;  %v1240_v43 = vpop.eup %882  ;;  %vm413_vm10 = vweird.f32 %v1138_v36 }
  0xbb   :  { %v410_v34 = vmul.f32 0.5, %v409_v20  ;;  %v309_v55 = vmul.f32 %v1199_v18, %v308_v25  ;;  %v296_v57 = vsel %vm295_vm9, %v1143_v40, %v292_v48  ;;  %vm414_vm12 = vweird.f32 %v1168_v59 }
  0xbc   :  { %v401_v22 = vsub.f32 1.5, %v400_v14  ;;  %v300_v39 = vmul.f32 0.5, %v299_v29  ;;  %v419_v46 = vmul.f32 %v1205_v26, %v418_v38  ;;  %888 = vrsqrt.f32 %v1244_v49  ;;  %vm1269_vm14 = vmor %vm413_vm10, %vm414_vm12 }
  0xbd   :  { %v411_v44 = vsub.f32 1.5, %v410_v34  ;;  %v1249_v52 = vpop.eup %884  ;;  %v318_v40 = vmul.f32 %v1240_v43, %v1078_v61  ;;  %v1267_v37 = vsel %vm192_vm13, %v296_v57, 0.0  ;;  %v310_v3 = vmul.f32 0.5, %v309_v55 }
  0xbe   :  { %v402_v19 = vmul.f32 %v1159_v54, %v401_v22  ;;  %v301_v53 = vsub.f32 1.5, %v300_v39  ;;  %v428_v63 = vmul.f32 %v1249_v52, %v1202_v23  ;;  %vm304_vm0 = vweird.f32 %v1174_v1  ;;  %v1314_v38 = vpop.xlane.xlu0 %162 }
  0xbf   :  { %v412_v0 = vmul.f32 %v1168_v59, %v411_v44  ;;  %v1277_v5 = vpop.eup %886  ;;  %v319_v17 = vmul.f32 %v1240_v43, %v318_v40  ;;  %vm305_vm2 = vmor %vm303_vm15, %vm304_vm0  ;;  %v311_v35 = vsub.f32 1.5, %v310_v3  ;;  %vm423_vm3 = vweird.f32 %v1162_v32  ;;  %v1352_v40 = vpop.xlane.xlu1 %165 }
  0xc0   :  { %v406_v51 = vsel %vm1236_vm7, %v1159_v54, %v402_v19  ;;  %v420_v54 = vmul.f32 0.5, %v419_v46  ;;  %v302_v47 = vmul.f32 %v1174_v1, %v301_v53  ;;  %v429_v12 = vmul.f32 %v1249_v52, %v428_v63  ;;  %v1388_v30 = vpop.xlane.xlu2 %168 }
  0xc1   :  { %666 = vxpose.xlu0.b32.cont [2/16] (narrow) %v1219_v28, 8  ;;  %v1258_v58 = vsel %vm203_vm11, %v406_v51, 0.0  ;;  %v416_v11 = vsel %vm1269_vm14, %v1168_v59, %v412_v0  ;;  %vm424_vm4 = vweird.f32 %v1205_v26  ;;  %890 = vrsqrt.f32 %v1280_v13 }
  0xc2   :  { %639 = vxpose.xlu2.b32.cont [7/16] (narrow) %v1229_v41, 8  ;;  %v421_v6 = vsub.f32 1.5, %v420_v54  ;;  %v1286_v14 = vpop.eup %888  ;;  %v306_v20 = vsel %vm305_vm2, %v1174_v1, %v302_v47  ;;  %v1293_v22 = vsel %vm204_vm1, %v416_v11, 0.0  ;;  %v430_v36 = vmul.f32 0.5, %v429_v12  ;;  %vm1305_vm6 = vmor %vm423_vm3, %vm424_vm4 }
  0xc3   :  { %v438_v59 = vmul.f32 %v1286_v14, %v1244_v49  ;;  %vm193_vm5 = vcmp.gt.f32.partialorder %v1062_v45, 0.0  ;;  %v328_v29 = vmul.f32 %v1277_v5, %v1076_v60  ;;  %892 = vrsqrt.f32 %v1096_v10 }
  0xc4   :  { %v422_v24 = vmul.f32 %v1205_v26, %v421_v6  ;;  %v1303_v1 = vsel %vm193_vm5, %v306_v20, 0.0  ;;  %v320_v31 = vmul.f32 0.5, %v319_v17  ;;  %vm313_vm7 = vweird.f32 %v1080_v62 }
  0xc5   :  { %v312_v45 = vmul.f32 %v1199_v18, %v311_v35  ;;  %vm314_vm8 = vweird.f32 %v1199_v18  ;;  %v431_v33 = vsub.f32 1.5, %v430_v36  ;;  %v439_v34 = vmul.f32 %v1286_v14, %v438_v59 }
  0xc6   :  { %vm205_vm9 = vcmp.gt.f32.partialorder %v1162_v32, 0.0  ;;  %v426_v19 = vsel %vm1305_vm6, %v1205_v26, %v422_v24  ;;  %v329_v25 = vmul.f32 %v1277_v5, %v328_v29  ;;  %894 = vrsqrt.f32 %v1094_v9  ;;  %vm315_vm10 = vmor %vm313_vm7, %vm314_vm8  ;;  %v1422_v55 = vpop.xlane.xlu0 %171 }
  0xc7   :  { %v1320_v39 = vpop.eup %890  ;;  %v321_v48 = vsub.f32 1.5, %v320_v31  ;;  %vm433_vm11 = vweird.f32 %v1202_v23  ;;  %v316_v42 = vsel %vm315_vm10, %v1199_v18, %v312_v45  ;;  %vm434_vm12 = vweird.f32 %v1249_v52 }
  0xc8   :  { %896 = vrsqrt.f32 %v1314_v38  ;;  %v1330_v32 = vsel %vm205_vm9, %v426_v19, 0.0  ;;  %v440_v26 = vmul.f32 0.5, %v439_v34  ;;  %v448_v46 = vmul.f32 %v1320_v39, %v1280_v13  ;;  %vm1339_vm14 = vmor %vm433_vm11, %vm434_vm12 }
  0xc9   :  { %667 = vxpose.xlu0.b32.cont [3/16] (narrow) %v1258_v58, 8  ;;  %v1327_v44 = vpop.eup %892  ;;  %vm194_vm13 = vcmp.gt.f32.partialorder %v1080_v62, 0.0  ;;  %v432_v51 = vmul.f32 %v1249_v52, %v431_v33  ;;  %v330_v53 = vmul.f32 0.5, %v329_v25  ;;  %v322_v54 = vmul.f32 %v1240_v43, %v321_v48 }
  0xca   :  { %640 = vxpose.xlu2.b32.cont [8/16] (narrow) %v1267_v37, 8  ;;  %v1337_v18 = vsel %vm194_vm13, %v316_v42, 0.0  ;;  %v338_v57 = vmul.f32 %v1327_v44, %v1096_v10  ;;  %vm324_vm15 = vweird.f32 %v1240_v43  ;;  %vm323_vm0 = vweird.f32 %v1078_v61 }
  0xcb   :  { %v441_v63 = vsub.f32 1.5, %v440_v26  ;;  %v449_v0 = vmul.f32 %v1320_v39, %v448_v46  ;;  %vm206_vm1 = vcmp.gt.f32.partialorder %v1202_v23, 0.0  ;;  %v436_v2 = vsel %vm1339_vm14, %v1249_v52, %v432_v51  ;;  %vm325_vm2 = vmor %vm323_vm0, %vm324_vm15  ;;  %v1488_v26 = vpop.xlane.xlu2 %177 }
  0xcc   :  { %v1348_v62 = vpop.eup %894  ;;  %v331_v47 = vsub.f32 1.5, %v330_v53  ;;  %898 = vrsqrt.f32 %v1091_v8  ;;  %v339_v6 = vmul.f32 %v1327_v44, %v338_v57  ;;  %vm443_vm3 = vweird.f32 %v1244_v49 }
  0xcd   :  { %v326_v12 = vsel %vm325_vm2, %v1240_v43, %v322_v54  ;;  %vm444_vm4 = vweird.f32 %v1286_v14  ;;  %900 = vrsqrt.f32 %v1352_v40  ;;  %v1366_v23 = vsel %vm206_vm1, %v436_v2, 0.0 }
  0xce   :  { %v1358_v3 = vpop.eup %896  ;;  %v450_v11 = vmul.f32 0.5, %v449_v0  ;;  %vm195_vm5 = vcmp.gt.f32.partialorder %v1078_v61, 0.0  ;;  %v442_v17 = vmul.f32 %v1286_v14, %v441_v63  ;;  %v348_v35 = vmul.f32 %v1348_v62, %v1094_v9  ;;  %vm1377_vm6 = vmor %vm443_vm3, %vm444_vm4 }
  0xcf   :  { %v458_v52 = vmul.f32 %v1358_v3, %v1314_v38  ;;  %v1375_v43 = vsel %vm195_vm5, %v326_v12, 0.0  ;;  %vm333_vm7 = vweird.f32 %v1076_v60  ;;  %v340_v36 = vmul.f32 0.5, %v339_v6 }
  0xd0   :  { %v332_v61 = vmul.f32 %v1277_v5, %v331_v47  ;;  %vm334_vm8 = vweird.f32 %v1277_v5  ;;  %v451_v24 = vsub.f32 1.5, %v450_v11  ;;  %vm207_vm9 = vcmp.gt.f32.partialorder %v1244_v49, 0.0 }
  0xd1   :  { %668 = vxpose.xlu0.b32.cont [4/16] (narrow) %v1293_v22, 8  ;;  %v459_v29 = vmul.f32 %v1358_v3, %v458_v52  ;;  %v446_v31 = vsel %vm1377_vm6, %v1286_v14, %v442_v17  ;;  %v349_v33 = vmul.f32 %v1348_v62, %v348_v35  ;;  %vm335_vm10 = vmor %vm333_vm7, %vm334_vm8  ;;  %v341_v34 = vsub.f32 1.5, %v340_v36  ;;  %v1457_v36 = vpop.xlane.xlu1 %174 }
  0xd2   :  { %641 = vxpose.xlu2.b32.cont [9/16] (narrow) %v1303_v1, 8  ;;  %v1385_v59 = vpop.eup %898  ;;  %vm453_vm11 = vweird.f32 %v1280_v13  ;;  %v336_v19 = vsel %vm335_vm10, %v1277_v5, %v332_v61  ;;  %vm454_vm12 = vweird.f32 %v1320_v39  ;;  %902 = vrsqrt.f32 %v1388_v30 }
  0xd3   :  { %v1394_v45 = vpop.eup %900  ;;  %v1401_v25 = vsel %vm207_vm9, %v446_v31, 0.0  ;;  %v460_v49 = vmul.f32 0.5, %v459_v29  ;;  %vm196_vm13 = vcmp.gt.f32.partialorder %v1076_v60, 0.0  ;;  %v452_v48 = vmul.f32 %v1320_v39, %v451_v24  ;;  %vm1413_vm14 = vmor %vm453_vm11, %vm454_vm12 }
  0xd4   :  { %v468_v14 = vmul.f32 %v1394_v45, %v1352_v40  ;;  %v358_v42 = vmul.f32 %v1385_v59, %v1091_v8  ;;  %904 = vrsqrt.f32 %v1116_v21  ;;  %v1411_v5 = vsel %vm196_vm13, %v336_v19, 0.0 }
  0xd5   :  { %v350_v46 = vmul.f32 0.5, %v349_v33  ;;  %vm343_vm15 = vweird.f32 %v1096_v10  ;;  %v342_v60 = vmul.f32 %v1327_v44, %v341_v34  ;;  %vm344_vm0 = vweird.f32 %v1327_v44 }
  0xd6   :  { %v461_v51 = vsub.f32 1.5, %v460_v49  ;;  %v469_v53 = vmul.f32 %v1394_v45, %v468_v14  ;;  %vm208_vm1 = vcmp.gt.f32.partialorder %v1280_v13, 0.0  ;;  %v456_v57 = vsel %vm1413_vm14, %v1320_v39, %v452_v48  ;;  %vm345_vm2 = vmor %vm343_vm15, %vm344_vm0 }
  0xd7   :  { %v359_v63 = vmul.f32 %v1385_v59, %v358_v42  ;;  %v351_v0 = vsub.f32 1.5, %v350_v46  ;;  %vm463_vm3 = vweird.f32 %v1314_v38  ;;  %v346_v2 = vsel %vm345_vm2, %v1327_v44, %v342_v60 }
  0xd8   :  { %v1428_v54 = vpop.eup %902  ;;  %vm464_vm4 = vweird.f32 %v1358_v3  ;;  %906 = vrsqrt.f32 %v1422_v55  ;;  %v1437_v13 = vsel %vm208_vm1, %v456_v57, 0.0  ;;  %v470_v6 = vmul.f32 0.5, %v469_v53 }
  0xd9   :  { %669 = vxpose.xlu0.b32.cont [5/16] (narrow) %v1330_v32, 8  ;;  %v478_v39 = vmul.f32 %v1428_v54, %v1388_v30  ;;  %vm197_vm5 = vcmp.gt.f32.partialorder %v1096_v10, 0.0  ;;  %v462_v12 = vmul.f32 %v1358_v3, %v461_v51  ;;  %v360_v11 = vmul.f32 0.5, %v359_v63  ;;  %vm1446_vm6 = vmor %vm463_vm3, %vm464_vm4 }
  0xda   :  { %642 = vxpose.xlu2.b32.cont [10/16] (narrow) %v1337_v18, 8  ;;  %v1434_v47 = vpop.eup %904  ;;  %v1444_v44 = vsel %vm197_vm5, %v346_v2, 0.0  ;;  %v352_v35 = vmul.f32 %v1348_v62, %v351_v0  ;;  %vm354_vm7 = vweird.f32 %v1348_v62  ;;  %vm353_vm8 = vweird.f32 %v1094_v9 }
  0xdb   :  { %v368_v17 = vmul.f32 %v1434_v47, %v1116_v21  ;;  %v471_v10 = vsub.f32 1.5, %v470_v6  ;;  %v479_v20 = vmul.f32 %v1428_v54, %v478_v39  ;;  %vm209_vm9 = vcmp.gt.f32.partialorder %v1314_v38, 0.0  ;;  %vm355_vm10 = vmor %vm353_vm8, %vm354_vm7 }
  0xdc   :  { %v466_v61 = vsel %vm1446_vm6, %v1358_v3, %v462_v12  ;;  %v361_v29 = vsub.f32 1.5, %v360_v11  ;;  %vm473_vm11 = vweird.f32 %v1352_v40  ;;  %v356_v33 = vsel %vm355_vm10, %v1348_v62, %v352_v35 }
  0xdd   :  { %v369_v31 = vmul.f32 %v1434_v47, %v368_v17  ;;  %vm474_vm12 = vweird.f32 %v1394_v45  ;;  %908 = vrsqrt.f32 %v1457_v36  ;;  %v1470_v34 = vsel %vm209_vm9, %v466_v61, 0.0  ;;  %v184_v61 = vpop.xlane.xlu1 %183 }
  0xde   :  { %v1463_v24 = vpop.eup %906  ;;  %v480_v38 = vmul.f32 0.5, %v479_v20  ;;  %vm198_vm13 = vcmp.gt.f32.partialorder %v1094_v9, 0.0  ;;  %v472_v19 = vmul.f32 %v1394_v45, %v471_v10  ;;  %vm1479_vm14 = vmor %vm473_vm11, %vm474_vm12  ;;  %vm363_vm15 = vweird.f32 %v1091_v8 }
  0xdf   :  { %v488_v3 = vmul.f32 %v1463_v24, %v1422_v55  ;;  %v1477_v49 = vsel %vm198_vm13, %v356_v33, 0.0  ;;  %v370_v14 = vmul.f32 0.5, %v369_v31  ;;  %v362_v48 = vmul.f32 %v1385_v59, %v361_v29 }
  0xe0   :  { %vm364_vm0 = vweird.f32 %v1385_v59  ;;  %v481_v9 = vsub.f32 1.5, %v480_v38  ;;  %vm210_vm1 = vcmp.gt.f32.partialorder %v1352_v40, 0.0  ;;  %v476_v46 = vsel %vm1479_vm14, %v1394_v45, %v472_v19 }
  0xe1   :  { %670 = vxpose.xlu0.b32.cont [6/16] (narrow) %v1366_v23, 8  ;;  %v489_v42 = vmul.f32 %v1463_v24, %v488_v3  ;;  %vm365_vm2 = vmor %vm363_vm15, %vm364_vm0  ;;  %v371_v51 = vsub.f32 1.5, %v370_v14  ;;  %vm483_vm3 = vweird.f32 %v1388_v30  ;;  %vm484_vm4 = vweird.f32 %v1428_v54 }
  0xe2   :  { %643 = vxpose.xlu2.b32.cont [11/16] (narrow) %v1375_v43, 8  ;;  %v366_v53 = vsel %vm365_vm2, %v1385_v59, %v362_v48  ;;  %910 = vrsqrt.f32 %v1488_v26  ;;  %v1498_v57 = vsel %vm210_vm1, %v476_v46, 0.0  ;;  %vm199_vm5 = vcmp.gt.f32.partialorder %v1091_v8, 0.0  ;;  %vm1506_vm6 = vmor %vm483_vm3, %vm484_vm4  ;;  %v1514_v8 = vpop.xlane.xlu0 %180 }
  0xe3   :  { %v909_v60 = vpop.eup %908  ;;  %v490_v63 = vmul.f32 0.5, %v489_v42  ;;  %v482_v45 = vmul.f32 %v1428_v54, %v481_v9  ;;  %v1504_v0 = vsel %vm199_vm5, %v366_v53, 0.0  ;;  %vm373_vm7 = vweird.f32 %v1116_v21 }
  0xe4   :  { %v498_v40 = vmul.f32 %v909_v60, %v1457_v36  ;;  %v372_v59 = vmul.f32 %v1434_v47, %v371_v51  ;;  %vm374_vm8 = vweird.f32 %v1434_v47  ;;  %vm211_vm9 = vcmp.gt.f32.partialorder %v1388_v30, 0.0 }
  0xe5   :  { %v491_v6 = vsub.f32 1.5, %v490_v63  ;;  %v486_v12 = vsel %vm1506_vm6, %v1428_v54, %v482_v45  ;;  %vm375_vm10 = vmor %vm373_vm7, %vm374_vm8  ;;  %vm493_vm11 = vweird.f32 %v1422_v55  ;;  %vm494_vm12 = vweird.f32 %v1463_v24 }
  0xe6   :  { %v499_v39 = vmul.f32 %v909_v60, %v498_v40  ;;  %v376_v52 = vsel %vm375_vm10, %v1434_v47, %v372_v59  ;;  %912 = vrsqrt.f32 %v1514_v8  ;;  %v1524_v17 = vsel %vm211_vm9, %v486_v12, 0.0  ;;  %vm495_vm14 = vmor %vm493_vm11, %vm494_vm12 }
  0xe7   :  { %vm200_vm13 = vcmp.gt.f32.partialorder %v1116_v21, 0.0  ;;  %v492_v30 = vmul.f32 %v1463_v24, %v491_v6  ;;  %vm212_vm15 = vcmp.gt.f32.partialorder %v1422_v55, 0.0  ;;  %vm503_vm0 = vweird.f32 %v1457_v36 }
  0xe8   :  { %v911_v11 = vpop.eup %910  ;;  %v500_v35 = vmul.f32 0.5, %v499_v39  ;;  %v1530_v54 = vsel %vm200_vm13, %v376_v52, 0.0  ;;  %vm504_vm1 = vweird.f32 %v909_v60  ;;  %914 = vrsqrt.f32 %v184_v61  ;;  %v916_v39 = vld [vmem:[#allocation2] sm:$0xff] }
  0xe9   :  { %671 = vxpose.xlu0.b32.cont [7/16] (narrow) %v1401_v25, 8  ;;  %v508_v10 = vmul.f32 %v911_v11, %v1488_v26  ;;  %v496_v29 = vsel %vm495_vm14, %v1463_v24, %v492_v30  ;;  %vm505_vm2 = vmor %vm503_vm0, %vm504_vm1  ;;  %vm213_vm3 = vcmp.gt.f32.partialorder %v1457_v36, 0.0  ;;  %vm513_vm4 = vweird.f32 %v1488_v26  ;;  %v918_v52 = vld [vmem:[#allocation2 + $0x20] sm:$0xff] }
  0xea   :  { %644 = vxpose.xlu2.b32.cont [12/16] (narrow) %v1411_v5, 8  ;;  %v501_v47 = vsub.f32 1.5, %v500_v35  ;;  %v1536_v21 = vsel %vm212_vm15, %v496_v29, 0.0  ;;  %vm514_vm5 = vweird.f32 %v911_v11  ;;  %vm214_vm7 = vcmp.gt.f32.partialorder %v1488_v26, 0.0 }
  0xeb   :  { %v509_v20 = vmul.f32 %v911_v11, %v508_v10  ;;  %vm515_vm6 = vmor %vm513_vm4, %vm514_vm5  ;;  %vm523_vm8 = vweird.f32 %v1514_v8  ;;  %vm215_vm11 = vcmp.gt.f32.partialorder %v1514_v8, 0.0  ;;  %vm533_vm12 = vweird.f32 %v184_v61  ;;  %v919_v10 = vld [vmem:[#allocation2 + $0x28] sm:$0xff] }
  0xec   :  { %v913_v31 = vpop.eup %912  ;;  %v502_v3 = vmul.f32 %v909_v60, %v501_v47  ;;  %vm216_vm15 = vcmp.gt.f32.partialorder %v184_v61, 0.0  ;;  %v1558_v12 = vmul.f32 %v916_v39, %v1071_v56  ;;  %v1564_v35 = vmul.f32 %v918_v52, %v1105_v16  ;;  %v920_v47 = vld [vmem:[#allocation2 + $0x10] sm:$0xff]  ;;  %v935_v39 = vld [vmem:[#allocation2 + $0x98] sm:$0xff] }
  0xed   :  { %v518_v33 = vmul.f32 %v913_v31, %v1514_v8  ;;  %v510_v38 = vmul.f32 0.5, %v509_v20  ;;  %vm524_vm9 = vweird.f32 %v913_v31  ;;  %v917_v8 = vld [vmem:[#allocation2 + $0x8] sm:$0xff]  ;;  %v1567_v30 = vmul.f32 %v919_v10, %v1105_v16  ;;  %v936_v10 = vld [vmem:[#allocation2 + $0x100] sm:$0xff] }
  0xee   :  { %v506_v55 = vsel %vm505_vm2, %v909_v60, %v502_v3  ;;  %v915_v24 = vpop.eup %914  ;;  %vm525_vm10 = vmor %vm523_vm8, %vm524_vm9  ;;  %v1570_v20 = vmul.f32 %v920_v47, %v1086_v4  ;;  %v924_v3 = vld [vmem:[#allocation2 + $0x38] sm:$0xff]  ;;  %v937_v47 = vld [vmem:[#allocation2 + $0x108] sm:$0xff] }
  0xef   :  { %v519_v19 = vmul.f32 %v913_v31, %v518_v33  ;;  %v511_v62 = vsub.f32 1.5, %v510_v38  ;;  %v1542_v14 = vsel %vm213_vm3, %v506_v55, 0.0  ;;  %v528_v9 = vmul.f32 %v915_v24, %v184_v61  ;;  %v921_v61 = vld [vmem:[#allocation2 + $0x18] sm:$0xff]  ;;  %v923_v33 = vld [vmem:[#allocation2 + $0x40] sm:$0xff]  ;;  %v926_v55 = vld [vmem:[#allocation2 + $0x50] sm:$0xff] }
  0xf0   :  { %vm534_vm13 = vweird.f32 %v915_v24  ;;  %v1573_v29 = vmul.f32 %v921_v61, %v1086_v4  ;;  %v1579_v38 = vmul.f32 %v923_v33, %v1154_v50  ;;  %v1582_v16 = vmul.f32 %v924_v3, %v1125_v27  ;;  %v939_v3 = vld [vmem:[#allocation2 + $0x118] sm:$0xff] }
  0xf1   :  { %672 = vxpose.xlu0.b32.cont [8/16] (narrow) %v1437_v13, 8  ;;  %v520_v48 = vmul.f32 0.5, %v519_v19  ;;  %v512_v42 = vmul.f32 %v911_v11, %v511_v62  ;;  %v529_v51 = vmul.f32 %v915_v24, %v528_v9  ;;  %vm535_vm14 = vmor %vm533_vm12, %vm534_vm13  ;;  %v925_v19 = vld [vmem:[#allocation2 + $0x48] sm:$0xff]  ;;  %v1588_v4 = vmul.f32 %v926_v55, %v1193_v15 }
  0xf2   :  { %645 = vxpose.xlu2.b32.cont [13/16] (narrow) %v1444_v44, 8  ;;  %v1585_v62 = vmul.f32 %v925_v19, %v1154_v50  ;;  %v1621_v61 = vmul.f32 %v937_v47, %v1182_v7  ;;  %v1629_v19 = vmul.f32 %v939_v3, %v1219_v28  ;;  %v949_v3 = vld [vmem:[#allocation2 + $0x158] sm:$0xff] }
  0xf3   :  { %v521_v46 = vsub.f32 1.5, %v520_v48  ;;  %v516_v53 = vsel %vm515_vm6, %v911_v11, %v512_v42  ;;  %v530_v60 = vmul.f32 0.5, %v529_v51  ;;  %v1561_v11 = vmul.f32 %v917_v8, %v1071_v56  ;;  %v928_v42 = vld [vmem:[#allocation2 + $0x60] sm:$0xff]  ;;  %v929_v51 = vld [vmem:[#allocation2 + $0x68] sm:$0xff] }
  0xf4   :  { %v1547_v36 = vsel %vm214_vm7, %v516_v53, 0.0  ;;  %v930_v53 = vld [vmem:[#allocation2 + $0x70] sm:$0xff]  ;;  %v1615_v8 = vmul.f32 %v935_v39, %v1337_v18  ;;  %v946_v39 = vld [vmem:[#allocation2 + $0xa0] sm:$0xff] }
  0xf5   :  { %v522_v63 = vmul.f32 %v913_v31, %v521_v46  ;;  %v531_v40 = vsub.f32 1.5, %v530_v60  ;;  %v1594_v46 = vmul.f32 %v928_v42, %v1229_v41  ;;  %v1600_v50 = vmul.f32 %v930_v53, %v1267_v37  ;;  %v931_v60 = vld [vmem:[#allocation2 + $0x78] sm:$0xff]  ;;  %v943_v53 = vld [vmem:[#allocation2 + $0x128] sm:$0xff] }
  0xf7   :  { %v526_v45 = vsel %vm525_vm10, %v913_v31, %v522_v63  ;;  %v532_v26 = vmul.f32 %v915_v24, %v531_v40  ;;  %v922_v31 = vld [vmem:[#allocation2 + $0x30] sm:$0xff]  ;;  %v1603_v63 = vmul.f32 %v931_v60, %v1267_v37  ;;  %v932_v40 = vld [vmem:[#allocation2 + $0x80] sm:$0xff]  ;;  %v1618_v37 = vmul.f32 %v936_v10, %v1182_v7  ;;  %v942_v7 = vld [vmem:[#allocation2 + $0x138] sm:$0xff] }
  0xf8   :  { %v1551_v2 = vsel %vm215_vm11, %v526_v45, 0.0  ;;  %v1576_v56 = vmul.f32 %v922_v31, %v1125_v27  ;;  %v1597_v27 = vmul.f32 %v929_v51, %v1229_v41  ;;  %v933_v45 = vld [vmem:[#allocation2 + $0x88] sm:$0xff]  ;;  %v938_v31 = vld [vmem:[#allocation2 + $0x110] sm:$0xff]  ;;  %v1638_v51 = vmul.f32 %v942_v7, %v1293_v22  ;;  %v944_v60 = vld [vmem:[#allocation2 + $0x140] sm:$0xff] }
  0xf9   :  { %673 = vxpose.xlu0.b32.cont [9/16] (narrow) %v1470_v34, 8  ;;  %v536_v59 = vsel %vm535_vm14, %v915_v24, %v532_v26  ;;  %v927_v24 = vld [vmem:[#allocation2 + $0x58] sm:$0xff]  ;;  %v1609_v26 = vmul.f32 %v933_v45, %v1303_v1  ;;  %v1652_v10 = vmul.f32 %v946_v39, %v1375_v43 }
  0xfa   :  { %646 = vxpose.xlu2.b32.cont [14/16] (narrow) %v1477_v49, 8  ;;  %v1554_v6 = vsel %vm216_vm15, %v536_v59, 0.0  ;;  %v1591_v48 = vmul.f32 %v927_v24, %v1193_v15  ;;  %v1606_v15 = vmul.f32 %v932_v40, %v1303_v1  ;;  %v934_v59 = vld [vmem:[#allocation2 + $0x90] sm:$0xff]  ;;  %v1624_v1 = vmul.f32 %v938_v31, %v1219_v28  ;;  %v945_v40 = vld [vmem:[#allocation2 + $0x148] sm:$0xff] }
  0xfb   :  { %1826 = vst [vmem:[#allocation8_spill] sm:$0xff] %v1554_v6  ;;  %v1612_v41 = vmul.f32 %v934_v59, %v1337_v18  ;;  %v940_v18 = vld [vmem:[#allocation2 + $0x120] sm:$0xff]  ;;  %v941_v24 = vld [vmem:[#allocation2 + $0x130] sm:$0xff]  ;;  %v1644_v28 = vmul.f32 %v944_v60, %v1330_v32  ;;  %v1647_v45 = vmul.f32 %v945_v40, %v1330_v32 }
  0xfc   :  { %v1632_v55 = vmul.f32 %v940_v18, %v1258_v58  ;;  %v1635_v42 = vmul.f32 %v941_v24, %v1293_v22  ;;  %v947_v22 = vld [vmem:[#allocation2 + $0xa8] sm:$0xff]  ;;  %v948_v31 = vld [vmem:[#allocation2 + $0x150] sm:$0xff]  ;;  %v1659_v18 = vmul.f32 %v949_v3, %v1366_v23  ;;  %v952_v40 = vld [vmem:[#allocation2 + $0xc0] sm:$0xff] }
  0xfd   :  { %v590_v47 = vmul.f32 %v947_v22, %v1375_v43  ;;  %v950_v24 = vld [vmem:[#allocation2 + $0xb0] sm:$0xff]  ;;  %v593_v39 = vmul.f32 %v952_v40, %v1444_v44  ;;  %v954_v3 = vld [vmem:[#allocation2 + $0x160] sm:$0xff] }
  0xfe   :  { %v591_v32 = vmul.f32 %v950_v24, %v1411_v5  ;;  %v1682_v24 = vmul.f32 %v954_v3, %v1401_v25 }
 0x101   :  { %674 = vxpose.xlu0.b32.cont [10/16] (narrow) %v1498_v57, 8 }
 0x102   :  { %647 = vxpose.xlu2.b32.cont [15/16] (narrow) %v1504_v0, 8 }
 0x109   :  { %675 = vxpose.xlu0.b32.cont [11/16] (narrow) %v1524_v17, 8 }
 0x10a   :  { %648 = vxpose.xlu2.b32.end [16/16] (narrow) %v1530_v54, 8 }
 0x111   :  { %676 = vxpose.xlu0.b32.cont [12/16] (narrow) %v1536_v21, 8 }
 0x119   :  { %677 = vxpose.xlu0.b32.cont [13/16] (narrow) %v1542_v14, 8 }
 0x121   :  { %678 = vxpose.xlu0.b32.cont [14/16] (narrow) %v1547_v36, 8 }
 0x129   :  { %679 = vxpose.xlu0.b32.cont [15/16] (narrow) %v1551_v2, 8 }
 0x12b   :  { %v649_v52 = vpop.trf.xlu2 }
 0x12c   :  { %v1649_v59 = vperm.slane %v649_v52, 0 }
 0x12e   :  { %v709_v3 = vmul.f32 %v1649_v59, %v1588_v4  ;;  %v713_v4 = vmul.f32 %v1649_v59, %v1600_v50  ;;  %v717_v50 = vmul.f32 %v1649_v59, %v1612_v41  ;;  %v721_v41 = vmul.f32 %v1649_v59, %v591_v32 }
 0x131   :  { %680 = vxpose.xlu0.b32.end [16/16] (narrow) %v1554_v6, 8  ;;  %v956_v6 = vld [vmem:[#allocation2 + $0xd0] sm:$0xff] }
 0x15d   :  { %v681_v9 = vpop.trf.xlu0 }
 0x15e   :  { %v1626_v33 = vperm.slane %v681_v9, 0  ;;  %v1641_v9 = vmul.f32 %v943_v53, %v1258_v58  ;;  %v1656_v58 = vmul.f32 %v948_v31, %v1366_v23  ;;  %v951_v53 = vld [vmem:[#allocation2 + $0xb8] sm:$0xff]  ;;  %v953_v23 = vld [vmem:[#allocation2 + $0xc8] sm:$0xff] }
 0x15f   :  { %v592_v60 = vmul.f32 %v951_v53, %v1411_v5  ;;  %v594_v22 = vmul.f32 %v953_v23, %v1444_v44  ;;  %v705_v44 = vmul.f32 %v1649_v59, %v1576_v56 }
 0x160   :  { %v700_v52 = vmul.f32 %v1626_v33, %v1561_v11  ;;  %v702_v7 = vmul.f32 %v1626_v33, %v1573_v29  ;;  %v704_v43 = vmul.f32 %v1626_v33, %v1567_v30  ;;  %v706_v31 = vmul.f32 %v1626_v33, %v1582_v16 }
 0x161   :  { %v699_v11 = vmul.f32 %v1649_v59, %v1558_v12  ;;  %v701_v29 = vmul.f32 %v1649_v59, %v1570_v20  ;;  %v703_v30 = vmul.f32 %v1649_v59, %v1564_v35  ;;  %v708_v5 = vmul.f32 %v1626_v33, %v1585_v62  ;;  %v955_v62 = vld [vmem:[#allocation2 + $0x168] sm:$0xff] }
 0x162   :  { %v707_v16 = vmul.f32 %v1649_v59, %v1579_v38  ;;  %v710_v12 = vmul.f32 %v1626_v33, %v1591_v48  ;;  %v712_v20 = vmul.f32 %v1626_v33, %v1597_v27  ;;  %v1693_v23 = vmul.f32 %v955_v62, %v1401_v25  ;;  %v957_v25 = vld [vmem:[#allocation2 + $0xd8] sm:$0xff] }
 0x163   :  { %v763_v35 = vpack.c.bf16 %v700_v52, %v699_v11  ;;  %v764_v53 = vpack.c.bf16 %v702_v7, %v701_v29  ;;  %v765_v40 = vpack.c.bf16 %v704_v43, %v703_v30  ;;  %v714_v56 = vmul.f32 %v1626_v33, %v1603_v63  ;;  %v959_v30 = vld [vmem:[#allocation2 + $0xe8] sm:$0xff] }
 0x164   :  { %v766_v38 = vpack.c.bf16 %v706_v31, %v705_v44  ;;  %v595_v48 = vmul.f32 %v956_v6, %v1477_v49  ;;  %v711_v27 = vmul.f32 %v1649_v59, %v1594_v46  ;;  %v716_v52 = vmul.f32 %v1626_v33, %v1609_v26  ;;  %v958_v6 = vld [vmem:[#allocation2 + $0xe0] sm:$0xff]  ;;  %v960_v44 = vld [vmem:[#allocation2 + $0x170] sm:$0xff] }
 0x165   :  { %v767_v7 = vpack.c.bf16 %v708_v5, %v707_v16  ;;  %795 = vst [vmem:[#allocation5] sm:$0xff] %v763_v35  ;;  %v596_v43 = vmul.f32 %v957_v25, %v1477_v49  ;;  %v718_v63 = vmul.f32 %v1626_v33, %v1615_v8  ;;  %v768_v31 = vpack.c.bf16 %v710_v12, %v709_v3 }
 0x166   :  { %796 = vst [vmem:[#allocation5 + $0x8] sm:$0xff] %v764_v53  ;;  %v597_v11 = vmul.f32 %v958_v6, %v1504_v0  ;;  %v715_v46 = vmul.f32 %v1649_v59, %v1606_v15  ;;  %v720_v26 = vmul.f32 %v1626_v33, %v590_v47  ;;  %v769_v29 = vpack.c.bf16 %v712_v20, %v711_v27  ;;  %v961_v20 = vld [vmem:[#allocation2 + $0xf8] sm:$0xff] }
 0x167   :  { %797 = vst [vmem:[#allocation5 + $0x10] sm:$0xff] %v765_v40  ;;  %v598_v49 = vmul.f32 %v959_v30, %v1504_v0  ;;  %v722_v8 = vmul.f32 %v1626_v33, %v592_v60  ;;  %v770_v5 = vpack.c.bf16 %v714_v56, %v713_v4  ;;  %v1718_v16 = vmul.f32 %v960_v44, %v1437_v13  ;;  %v962_v53 = vld [vmem:[#allocation2 + $0x178] sm:$0xff] }
 0x168   :  { %798 = vst [vmem:[#allocation5 + $0x18] sm:$0xff] %v766_v38  ;;  %v719_v15 = vmul.f32 %v1649_v59, %v1652_v10  ;;  %v724_v47 = vmul.f32 %v1626_v33, %v594_v22  ;;  %v771_v12 = vpack.c.bf16 %v716_v52, %v715_v46  ;;  %v600_v0 = vmul.f32 %v961_v20, %v1530_v54  ;;  %v963_v22 = vld [vmem:[#allocation2 + $0xf0] sm:$0xff]  ;;  %v964_v52 = vld [vmem:[#allocation2 + $0x180] sm:$0xff] }
 0x169   :  { %799 = vst [vmem:[#allocation5 + $0x20] sm:$0xff] %v767_v7  ;;  %v726_v60 = vmul.f32 %v1626_v33, %v596_v43  ;;  %v772_v35 = vpack.c.bf16 %v718_v63, %v717_v50  ;;  %v616_v40 = vmul.f32 %v962_v53, %v1437_v13  ;;  %v723_v62 = vmul.f32 %v1649_v59, %v593_v39  ;;  %v965_v43 = vld [vmem:[#allocation2 + $0x188] sm:$0xff] }
 0x16a   :  { %800 = vst [vmem:[#allocation5 + $0x28] sm:$0xff] %v768_v31  ;;  %v728_v10 = vmul.f32 %v1626_v33, %v598_v49  ;;  %v773_v3 = vpack.c.bf16 %v720_v26, %v719_v15  ;;  %v599_v56 = vmul.f32 %v963_v22, %v1530_v54  ;;  %v725_v38 = vmul.f32 %v1649_v59, %v595_v48  ;;  %v966_v31 = vld [vmem:[#allocation2 + $0x190] sm:$0xff]  ;;  %v967_v26 = vld [vmem:[#allocation2 + $0x198] sm:$0xff]  ;;  %v968_v49 = vld [vmem:[#allocation2 + $0x1a0] sm:$0xff] }
 0x16b   :  { %801 = vst [vmem:[#allocation5 + $0x30] sm:$0xff] %v769_v29  ;;  %v730_v32 = vmul.f32 %v1626_v33, %v600_v0  ;;  %v774_v27 = vpack.c.bf16 %v722_v8, %v721_v41  ;;  %v617_v7 = vmul.f32 %v964_v52, %v1470_v34  ;;  %v727_v13 = vmul.f32 %v1649_v59, %v597_v11  ;;  %v970_v15 = vld [vmem:[#allocation2 + $0x1b0] sm:$0xff]  ;;  %v972_v41 = vld [vmem:[#allocation2 + $0x1c0] sm:$0xff]  ;;  %v973_v53 = vld [vmem:[#allocation2 + $0x1c8] sm:$0xff] }
 0x16c   :  { %802 = vst [vmem:[#allocation5 + $0x38] sm:$0xff] %v770_v5  ;;  %v732_v39 = vmul.f32 %v1626_v33, %v1621_v61  ;;  %v775_v25 = vpack.c.bf16 %v724_v47, %v723_v62  ;;  %v618_v4 = vmul.f32 %v965_v43, %v1470_v34  ;;  %v729_v54 = vmul.f32 %v1649_v59, %v599_v56  ;;  %v976_v52 = vld [vmem:[#allocation2 + $0x1e8] sm:$0xff] }
 0x16d   :  { %803 = vst [vmem:[#allocation5 + $0x40] sm:$0xff] %v771_v12  ;;  %v734_v48 = vmul.f32 %v1626_v33, %v1629_v19  ;;  %v776_v63 = vpack.c.bf16 %v726_v60, %v725_v38  ;;  %v619_v6 = vmul.f32 %v966_v31, %v1498_v57  ;;  %v731_v11 = vmul.f32 %v1649_v59, %v1618_v37  ;;  %v975_v38 = vld [vmem:[#allocation2 + $0x1d8] sm:$0xff]  ;;  %v978_v31 = vld [vmem:[#allocation2 + $0x1e0] sm:$0xff] }
 0x16e   :  { %804 = vst [vmem:[#allocation5 + $0x48] sm:$0xff] %v772_v35  ;;  %v736_v61 = vmul.f32 %v1626_v33, %v1641_v9  ;;  %v777_v46 = vpack.c.bf16 %v728_v10, %v727_v13  ;;  %v620_v34 = vmul.f32 %v967_v26, %v1498_v57  ;;  %v733_v29 = vmul.f32 %v1649_v59, %v1624_v1  ;;  %v969_v57 = vld [vmem:[#allocation2 + $0x1a8] sm:$0xff]  ;;  %v974_v10 = vld [vmem:[#allocation2 + $0x1d0] sm:$0xff] }
 0x16f   :  { %805 = vst [vmem:[#allocation5 + $0x50] sm:$0xff] %v773_v3  ;;  %v738_v19 = vmul.f32 %v1626_v33, %v1638_v51  ;;  %v778_v30 = vpack.c.bf16 %v730_v32, %v729_v54  ;;  %v621_v50 = vmul.f32 %v968_v49, %v1524_v17  ;;  %v735_v37 = vmul.f32 %v1649_v59, %v1632_v55  ;;  %v1827_v54 = vld [vmem:[#allocation8_spill] sm:$0xff] }
 0x170   :  { %806 = vst [vmem:[#allocation5 + $0x58] sm:$0xff] %v774_v27  ;;  %v740_v9 = vmul.f32 %v1626_v33, %v1647_v45  ;;  %v779_v8 = vpack.c.bf16 %v732_v39, %v731_v11  ;;  %v622_v5 = vmul.f32 %v969_v57, %v1524_v17  ;;  %v737_v1 = vmul.f32 %v1649_v59, %v1635_v42  ;;  %v971_v17 = vld [vmem:[#allocation2 + $0x1b8] sm:$0xff] }
 0x171   :  { %807 = vst [vmem:[#allocation5 + $0x60] sm:$0xff] %v775_v25  ;;  %v742_v51 = vmul.f32 %v1626_v33, %v1659_v18  ;;  %v780_v44 = vpack.c.bf16 %v734_v48, %v733_v29  ;;  %v623_v47 = vmul.f32 %v970_v15, %v1536_v21  ;;  %v739_v55 = vmul.f32 %v1649_v59, %v1644_v28 }
 0x172   :  { %808 = vst [vmem:[#allocation5 + $0x68] sm:$0xff] %v776_v63  ;;  %v744_v45 = vmul.f32 %v1626_v33, %v1693_v23  ;;  %v781_v12 = vpack.c.bf16 %v736_v61, %v735_v37  ;;  %v624_v20 = vmul.f32 %v971_v17, %v1536_v21  ;;  %v741_v42 = vmul.f32 %v1649_v59, %v1656_v58 }
 0x173   :  { %809 = vst [vmem:[#allocation5 + $0x70] sm:$0xff] %v777_v46  ;;  %v746_v18 = vmul.f32 %v1626_v33, %v616_v40  ;;  %v782_v0 = vpack.c.bf16 %v738_v19, %v737_v1  ;;  %v625_v60 = vmul.f32 %v972_v41, %v1542_v14  ;;  %v743_v28 = vmul.f32 %v1649_v59, %v1682_v24 }
 0x174   :  { %810 = vst [vmem:[#allocation5 + $0x78] sm:$0xff] %v778_v30  ;;  %v748_v23 = vmul.f32 %v1626_v33, %v618_v4  ;;  %v783_v35 = vpack.c.bf16 %v740_v9, %v739_v55  ;;  %v626_v21 = vmul.f32 %v973_v53, %v1542_v14  ;;  %v745_v58 = vmul.f32 %v1649_v59, %v1718_v16  ;;  %v977_v4 = vld [vmem:[#allocation2 + $0x1f8] sm:$0xff] }
 0x175   :  { %811 = vst [vmem:[#allocation5 + $0x80] sm:$0xff] %v779_v8  ;;  %v750_v40 = vmul.f32 %v1626_v33, %v620_v34  ;;  %v784_v62 = vpack.c.bf16 %v742_v51, %v741_v42  ;;  %v627_v3 = vmul.f32 %v974_v10, %v1547_v36  ;;  %v747_v22 = vmul.f32 %v1649_v59, %v617_v7  ;;  %v979_v34 = vld [vmem:[#allocation2 + $0x1f0] sm:$0xff] }
 0x176   :  { %812 = vst [vmem:[#allocation5 + $0x88] sm:$0xff] %v780_v44  ;;  %v752_v24 = vmul.f32 %v1626_v33, %v622_v5  ;;  %v785_v56 = vpack.c.bf16 %v744_v45, %v743_v28  ;;  %v628_v32 = vmul.f32 %v975_v38, %v1547_v36  ;;  %v749_v14 = vmul.f32 %v1649_v59, %v619_v6 }
 0x177   :  { %813 = vst [vmem:[#allocation5 + $0x90] sm:$0xff] %v781_v12  ;;  %v754_v16 = vmul.f32 %v1626_v33, %v624_v20  ;;  %v786_v27 = vpack.c.bf16 %v746_v18, %v745_v58  ;;  %v630_v13 = vmul.f32 %v976_v52, %v1551_v2  ;;  %v751_v39 = vmul.f32 %v1649_v59, %v621_v50 }
 0x178   :  { %814 = vst [vmem:[#allocation5 + $0x98] sm:$0xff] %v782_v0  ;;  %v756_v7 = vmul.f32 %v1626_v33, %v626_v21  ;;  %v787_v25 = vpack.c.bf16 %v748_v23, %v747_v22  ;;  %v753_v43 = vmul.f32 %v1649_v59, %v623_v47  ;;  %v632_v36 = vmul.f32 %v977_v4, %v1827_v54 }
 0x179   :  { %815 = vst [vmem:[#allocation5 + $0xa0] sm:$0xff] %v783_v35  ;;  %v758_v48 = vmul.f32 %v1626_v33, %v628_v32  ;;  %v788_v63 = vpack.c.bf16 %v750_v40, %v749_v14  ;;  %v629_v6 = vmul.f32 %v978_v31, %v1551_v2  ;;  %v755_v11 = vmul.f32 %v1649_v59, %v625_v60 }
 0x17a   :  { %816 = vst [vmem:[#allocation5 + $0xa8] sm:$0xff] %v784_v62  ;;  %v760_v61 = vmul.f32 %v1626_v33, %v630_v13  ;;  %v789_v46 = vpack.c.bf16 %v752_v24, %v751_v39  ;;  %v757_v26 = vmul.f32 %v1649_v59, %v627_v3  ;;  %v631_v29 = vmul.f32 %v979_v34, %v1827_v54 }
 0x17b   :  { %817 = vst [vmem:[#allocation5 + $0xb0] sm:$0xff] %v785_v56  ;;  %v762_v19 = vmul.f32 %v1626_v33, %v632_v36  ;;  %v790_v30 = vpack.c.bf16 %v754_v16, %v753_v43  ;;  %v759_v49 = vmul.f32 %v1649_v59, %v629_v6  ;;  %v791_v50 = vpack.c.bf16 %v756_v7, %v755_v11 }
 0x17c   :  { %818 = vst [vmem:[#allocation5 + $0xb8] sm:$0xff] %v786_v27  ;;  %v761_v2 = vmul.f32 %v1649_v59, %v631_v29  ;;  %v792_v37 = vpack.c.bf16 %v758_v48, %v757_v26 }
 0x17d   :  { %819 = vst [vmem:[#allocation5 + $0xc0] sm:$0xff] %v787_v25  ;;  %v793_v9 = vpack.c.bf16 %v760_v61, %v759_v49 }
 0x17e   :  { %820 = vst [vmem:[#allocation5 + $0xc8] sm:$0xff] %v788_v63  ;;  %v794_v8 = vpack.c.bf16 %v762_v19, %v761_v2 }
 0x17f   :  { %821 = vst [vmem:[#allocation5 + $0xd0] sm:$0xff] %v789_v46 }
 0x180   :  { %822 = vst [vmem:[#allocation5 + $0xd8] sm:$0xff] %v790_v30 }
 0x181   :  { %823 = vst [vmem:[#allocation5 + $0xe0] sm:$0xff] %v791_v50 }
 0x182   :  { %824 = vst [vmem:[#allocation5 + $0xe8] sm:$0xff] %v792_v37 }
 0x183   :  { %825 = vst [vmem:[#allocation5 + $0xf0] sm:$0xff] %v793_v9 }
 0x184   :  { %826 = vst [vmem:[#allocation5 + $0xf8] sm:$0xff] %v794_v8 }
 0x185   :  { %839 = dma.vmem_to_hbm [thread:$0]  %s832_s13, 4096, %s834_s16, [#allocation4], %s1036_s17, %s1036_s17, %s1037_s18  }
 0x186   :  { %1030 = dma.done.wait [#allocation4], 4096  }
 0x187   :  { %1031 = vsyncadd [#allocation4], 4294963200 }
 0x188   :  { %844 = vsyncpa [#allocation3], 1 }
 0x189   :  { %845 = vsyncpa [#allocation4], 1 }

</bundles_post_ra>
